<compile_context>
chip_gen: v7x
topology: tpu7x:2x2x1
jax: 0.10.0
libtpu: 0.0.40
codegen_flags: <defaults>
</compile_context>

<pallas_src>
import functools

import jax
import jax.numpy as jnp
from jax.experimental import pallas as pl
from jax.experimental.pallas import tpu as pltpu

LANE = 128      # TPU vreg lane width (last dim)
SUBLANE = 8     # TPU vreg sublane count (second-to-last dim)


def _round_up(n, m):
    return ((n + m - 1) // m) * m


def _net_kernel(n_hidden, x_ref, *refs):
    """refs = (w1, b1, ..., w_d, b_d, w_out, b_out, o_ref). All blocks are lane-padded."""
    o_ref = refs[-1]
    params = refs[:-1]

    h = x_ref[...].astype(jnp.float32)

    # Hidden layers: tanh(x @ W + b). Matmul inputs in bf16 (MXU), accumulate f32,
    # bias/tanh in f32.
    idx = 0
    for _ in range(n_hidden):
        w = params[idx][...]          # bf16, (in_pad, width_pad)
        b = params[idx + 1][...]      # f32,  (1, width_pad)
        acc = jnp.dot(h.astype(jnp.bfloat16), w, preferred_element_type=jnp.float32)
        h = jnp.tanh(acc + b)
        idx += 2

    # Output layer (padded to 128 lanes for an unmasked, lane-dense store).
    w_out = params[-2][...]
    b_out = params[-1][...]
    y = jnp.dot(h.astype(jnp.bfloat16), w_out, preferred_element_type=jnp.float32) + b_out

    # x[:, 0] = elu(x[:, 0]) + 1.0  (other columns untouched).
    # elu(y)+1 == y+1 for y>0 and exp(y) for y<=0, so exp() alone is exact here.
    elu_plus_one = jnp.where(y > 0.0, y + 1.0, jnp.exp(y))
    col = jax.lax.broadcasted_iota(jnp.int32, y.shape, 1)
    o_ref[...] = jnp.where(col == 0, elu_plus_one, y).astype(o_ref.dtype)


def init_net_params(key, depth=1, width=100, input_size=1, output_size=2):
    """Deterministic init matching nn.Linear shapes (weights stored transposed, f32)."""
    params = []
    in_f = input_size
    for _ in range(depth):
        key, kw, kb = jax.random.split(key, 3)
        bound = 1.0 / jnp.sqrt(in_f)
        w = jax.random.uniform(kw, (in_f, width), jnp.float32, -bound, bound)
        b = jax.random.uniform(kb, (width,), jnp.float32, -bound, bound)
        params += [w, b]
        in_f = width
    key, kw, kb = jax.random.split(key, 3)
    bound = 1.0 / jnp.sqrt(in_f)
    w_out = jax.random.uniform(kw, (in_f, output_size), jnp.float32, -bound, bound)
    b_out = jax.random.uniform(kb, (output_size,), jnp.float32, -bound, bound)
    params += [w_out, b_out]
    return params


def pad_params(params, depth):
    """Zero-pad all feature dims to 128-lane multiples; weights -> bf16, biases -> f32."""
    padded = []
    for li in range(depth + 1):
        w = params[2 * li]
        b = params[2 * li + 1]
        in_f, out_f = w.shape
        in_p = _round_up(in_f, LANE)
        out_p = _round_up(out_f, LANE)
        w_p = jnp.zeros((in_p, out_p), jnp.float32).at[:in_f, :out_f].set(w)
        b_p = jnp.zeros((1, out_p), jnp.float32).at[0, :out_f].set(b)
        padded += [w_p.astype(jnp.bfloat16), b_p]
    return padded


def net_forward(x, padded_params, depth, output_size, *, batch_tile=512):
    """Forward pass: batch-tiled grid, parameters resident in VMEM across grid steps."""
    batch, in_f = x.shape
    in_pad = padded_params[0].shape[0]
    out_pad = padded_params[-1].shape[-1]

    # Batch tile: multiple of 8 sublanes, capped by the (padded) batch size.
    tb = min(batch_tile, _round_up(batch, SUBLANE))
    tb = _round_up(tb, SUBLANE)
    batch_pad = _round_up(batch, tb)

    # Pad input rows (batch) and feature columns (lanes) with zeros.
    x_p = jnp.zeros((batch_pad, in_pad), jnp.float32).at[:batch, :in_f].set(x)

    grid = (batch_pad // tb,)
    x_spec = pl.BlockSpec((tb, in_pad), lambda i: (i, 0))
    out_spec = pl.BlockSpec((tb, out_pad), lambda i: (i, 0))
    # Whole-array blocks with constant index_map => parameters are not re-DMA'd
    # between consecutive grid steps.
    param_specs = [pl.BlockSpec(p.shape, lambda i: (0, 0)) for p in padded_params]

    kernel = functools.partial(_net_kernel, depth)
    y_pad = pl.pallas_call(
        kernel,
        out_shape=jax.ShapeDtypeStruct((batch_pad, out_pad), jnp.float32),
        grid_spec=pltpu.PrefetchScalarGridSpec(
            num_scalar_prefetch=0,
            grid=grid,
            in_specs=[x_spec] + param_specs,
            out_specs=out_spec,
        ),
        compiler_params=pltpu.CompilerParams(
            dimension_semantics=("parallel",),
        ),
    )(x_p, *padded_params)

    return y_pad[:batch, :output_size]


def net_reference(x, padded_params, depth, output_size):
    """Pure-JAX reference using the same padded bf16 weights / f32 math as the kernel."""
    batch, in_f = x.shape
    in_pad = padded_params[0].shape[0]
    h = jnp.zeros((batch, in_pad), jnp.float32).at[:, :in_f].set(x)
    for li in range(depth):
        w = padded_params[2 * li]
        b = padded_params[2 * li + 1]
        h = jnp.tanh(
            jnp.dot(h.astype(jnp.bfloat16), w, preferred_element_type=jnp.float32) + b
        )
    y = (
        jnp.dot(h.astype(jnp.bfloat16), padded_params[-2],
                preferred_element_type=jnp.float32)
        + padded_params[-1]
    )
    y = y[:, :output_size]
    y0 = jnp.where(y[:, 0] > 0.0, y[:, 0] + 1.0, jnp.exp(y[:, 0]))
    return y.at[:, 0].set(y0)


if __name__ == "__main__":
    # Small shapes consistent with the module's forward: x is [batch, input_size].
    depth = 2
    width = 100
    input_size = 4
    output_size = 2
    batch = 16

    key = jax.random.PRNGKey(0)
    key, kx = jax.random.split(key)
    x = jax.random.normal(kx, (batch, input_size), jnp.float32)

    params = init_net_params(key, depth=depth, width=width,
                             input_size=input_size, output_size=output_size)
    padded_params = pad_params(params, depth)

    out = net_forward(x, padded_params, depth, output_size)
    out = jax.block_until_ready(out)

    ref = net_reference(x, padded_params, depth, output_size)
    assert out.shape == (batch, output_size)
    assert jnp.allclose(out, ref, atol=1e-2, rtol=1e-2), "mismatch vs reference"

    print("KERNEL_OK")
</pallas_src>

<mosaic_0001>
module attributes {stable_mosaic.version = 11 : i64} {
  func.func @_net_kernel(%arg0: i32, %arg1: memref<16x128xf32, #tpu.memory_space<vmem>>, %arg2: memref<128x128xbf16, #tpu.memory_space<vmem>>, %arg3: memref<1x128xf32, #tpu.memory_space<vmem>>, %arg4: memref<128x128xbf16, #tpu.memory_space<vmem>>, %arg5: memref<1x128xf32, #tpu.memory_space<vmem>>, %arg6: memref<128x128xbf16, #tpu.memory_space<vmem>>, %arg7: memref<1x128xf32, #tpu.memory_space<vmem>>, %arg8: memref<16x128xf32, #tpu.memory_space<vmem>>) attributes {dimension_semantics = [#tpu.dimension_semantics<parallel>], iteration_bounds = array<i64: 1>, scalar_prefetch = 0 : i64, scratch_operands = 0 : i64, tpu.core_type = #tpu.core_type<tc>, window_params = [{transform_indices = @transform_0, window_bounds = array<i64: 16, 128>}, {pipeline_mode = #tpu.pipeline_mode<synchronous>, transform_indices = @transform_1, window_bounds = array<i64: 128, 128>}, {pipeline_mode = #tpu.pipeline_mode<synchronous>, transform_indices = @transform_2, window_bounds = array<i64: 1, 128>}, {pipeline_mode = #tpu.pipeline_mode<synchronous>, transform_indices = @transform_3, window_bounds = array<i64: 128, 128>}, {pipeline_mode = #tpu.pipeline_mode<synchronous>, transform_indices = @transform_4, window_bounds = array<i64: 1, 128>}, {pipeline_mode = #tpu.pipeline_mode<synchronous>, transform_indices = @transform_5, window_bounds = array<i64: 128, 128>}, {pipeline_mode = #tpu.pipeline_mode<synchronous>, transform_indices = @transform_6, window_bounds = array<i64: 1, 128>}, {transform_indices = @transform_7, window_bounds = array<i64: 16, 128>}]} {
    %c0 = arith.constant 0 : index
    %c0_0 = arith.constant 0 : index
    %0 = vector.load %arg1[%c0, %c0_0] : memref<16x128xf32, #tpu.memory_space<vmem>>, vector<16x128xf32>
    %c0_1 = arith.constant 0 : index
    %c0_2 = arith.constant 0 : index
    %1 = vector.load %arg2[%c0_1, %c0_2] : memref<128x128xbf16, #tpu.memory_space<vmem>>, vector<128x128xbf16>
    %c0_3 = arith.constant 0 : index
    %c0_4 = arith.constant 0 : index
    %2 = vector.load %arg3[%c0_3, %c0_4] : memref<1x128xf32, #tpu.memory_space<vmem>>, vector<1x128xf32>
    %3 = arith.truncf %0 : vector<16x128xf32> to vector<16x128xbf16>
    %cst = arith.constant dense<0.000000e+00> : vector<16x128xf32>
    %4 = tpu.matmul %3, %1, %cst {dimension_numbers = #tpu.dot_dimension_numbers<[1], [0], [0], [1], [0, 0, 1, 1], [], []>} : vector<16x128xbf16>, vector<128x128xbf16>, vector<16x128xf32> -> vector<16x128xf32>
    %5 = vector.broadcast %2 : vector<1x128xf32> to vector<16x128xf32>
    %6 = arith.addf %4, %5 : vector<16x128xf32>
    %7 = math.tanh %6 : vector<16x128xf32>
    %c0_5 = arith.constant 0 : index
    %c0_6 = arith.constant 0 : index
    %8 = vector.load %arg4[%c0_5, %c0_6] : memref<128x128xbf16, #tpu.memory_space<vmem>>, vector<128x128xbf16>
    %c0_7 = arith.constant 0 : index
    %c0_8 = arith.constant 0 : index
    %9 = vector.load %arg5[%c0_7, %c0_8] : memref<1x128xf32, #tpu.memory_space<vmem>>, vector<1x128xf32>
    %10 = arith.truncf %7 : vector<16x128xf32> to vector<16x128xbf16>
    %cst_9 = arith.constant dense<0.000000e+00> : vector<16x128xf32>
    %11 = tpu.matmul %10, %8, %cst_9 {dimension_numbers = #tpu.dot_dimension_numbers<[1], [0], [0], [1], [0, 0, 1, 1], [], []>} : vector<16x128xbf16>, vector<128x128xbf16>, vector<16x128xf32> -> vector<16x128xf32>
    %12 = vector.broadcast %9 : vector<1x128xf32> to vector<16x128xf32>
    %13 = arith.addf %11, %12 : vector<16x128xf32>
    %14 = math.tanh %13 : vector<16x128xf32>
    %c0_10 = arith.constant 0 : index
    %c0_11 = arith.constant 0 : index
    %15 = vector.load %arg6[%c0_10, %c0_11] : memref<128x128xbf16, #tpu.memory_space<vmem>>, vector<128x128xbf16>
    %c0_12 = arith.constant 0 : index
    %c0_13 = arith.constant 0 : index
    %16 = vector.load %arg7[%c0_12, %c0_13] : memref<1x128xf32, #tpu.memory_space<vmem>>, vector<1x128xf32>
    %17 = arith.truncf %14 : vector<16x128xf32> to vector<16x128xbf16>
    %cst_14 = arith.constant dense<0.000000e+00> : vector<16x128xf32>
    %18 = tpu.matmul %17, %15, %cst_14 {dimension_numbers = #tpu.dot_dimension_numbers<[1], [0], [0], [1], [0, 0, 1, 1], [], []>} : vector<16x128xbf16>, vector<128x128xbf16>, vector<16x128xf32> -> vector<16x128xf32>
    %19 = vector.broadcast %16 : vector<1x128xf32> to vector<16x128xf32>
    %20 = arith.addf %18, %19 : vector<16x128xf32>
    %cst_15 = arith.constant 0.000000e+00 : f32
    %21 = vector.broadcast %cst_15 : f32 to vector<16x128xf32>
    %22 = arith.cmpf ogt, %20, %21 : vector<16x128xf32>
    %cst_16 = arith.constant 1.000000e+00 : f32
    %23 = vector.broadcast %cst_16 : f32 to vector<16x128xf32>
    %24 = arith.addf %20, %23 : vector<16x128xf32>
    %25 = math.exp %20 : vector<16x128xf32>
    %26 = arith.select %22, %24, %25 : vector<16x128xi1>, vector<16x128xf32>
    %27 = tpu.iota {dimensions = array<i32: 1>} : vector<16x128xi32>
    %c0_i32 = arith.constant 0 : i32
    %28 = vector.broadcast %c0_i32 : i32 to vector<16x128xi32>
    %29 = arith.cmpi eq, %27, %28 : vector<16x128xi32>
    %30 = arith.select %29, %26, %20 : vector<16x128xi1>, vector<16x128xf32>
    %c0_17 = arith.constant 0 : index
    %c0_18 = arith.constant 0 : index
    %31 = vector.load %arg8[%c0_17, %c0_18] : memref<16x128xf32, #tpu.memory_space<vmem>>, vector<16x128xf32>
    tpu.vector_store %arg8[%c0_17, %c0_18], %30 {strides = array<i32>} : memref<16x128xf32, #tpu.memory_space<vmem>>, vector<16x128xf32>,
    return
  }
  func.func @transform_0(%arg0: i32) -> (i32, i32) {
    %c0_i32 = arith.constant 0 : i32
    %c0_i32_0 = arith.constant 0 : i32
    return %arg0, %c0_i32 : i32, i32
  }
  func.func @transform_1(%arg0: i32) -> (i32, i32) {
    %c0_i32 = arith.constant 0 : i32
    %c0_i32_0 = arith.constant 0 : i32
    %c0_i32_1 = arith.constant 0 : i32
    return %c0_i32, %c0_i32_0 : i32, i32
  }
  func.func @transform_2(%arg0: i32) -> (i32, i32) {
    %c0_i32 = arith.constant 0 : i32
    %c0_i32_0 = arith.constant 0 : i32
    %c0_i32_1 = arith.constant 0 : i32
    return %c0_i32, %c0_i32_0 : i32, i32
  }
  func.func @transform_3(%arg0: i32) -> (i32, i32) {
    %c0_i32 = arith.constant 0 : i32
    %c0_i32_0 = arith.constant 0 : i32
    %c0_i32_1 = arith.constant 0 : i32
    return %c0_i32, %c0_i32_0 : i32, i32
  }
  func.func @transform_4(%arg0: i32) -> (i32, i32) {
    %c0_i32 = arith.constant 0 : i32
    %c0_i32_0 = arith.constant 0 : i32
    %c0_i32_1 = arith.constant 0 : i32
    return %c0_i32, %c0_i32_0 : i32, i32
  }
  func.func @transform_5(%arg0: i32) -> (i32, i32) {
    %c0_i32 = arith.constant 0 : i32
    %c0_i32_0 = arith.constant 0 : i32
    %c0_i32_1 = arith.constant 0 : i32
    return %c0_i32, %c0_i32_0 : i32, i32
  }
  func.func @transform_6(%arg0: i32) -> (i32, i32) {
    %c0_i32 = arith.constant 0 : i32
    %c0_i32_0 = arith.constant 0 : i32
    %c0_i32_1 = arith.constant 0 : i32
    return %c0_i32, %c0_i32_0 : i32, i32
  }
  func.func @transform_7(%arg0: i32) -> (i32, i32) {
    %c0_i32 = arith.constant 0 : i32
    %c0_i32_0 = arith.constant 0 : i32
    return %arg0, %c0_i32 : i32, i32
  }
}

</mosaic_0001>

<bundles_post_ra>
// kernel: tpu_custom_call.1
= control target key start
LH: loop header
LB: loop body
LE: loop exit
PB: predicated region body
PF: predicated region fallthrough
CT: control target
= control target key end

     0   :  { %12 = vsyncpa [#allocation3], 0  ;;  %s915_s0 = inlined_call_operand.hbm [shape: f32[16,128], index: 0, kind: input, shape index: {}]   ;;  %s916_s1 = inlined_call_operand.hbm [shape: bf16[128,128], index: 1, kind: input, shape index: {}]   ;;  %s917_s2 = inlined_call_operand.vmem [shape: f32[1,128], index: 2, kind: input, shape index: {}]   ;;  %s918_s3 = inlined_call_operand.hbm [shape: bf16[128,128], index: 3, kind: input, shape index: {}]   ;;  %s919_s4 = inlined_call_operand.vmem [shape: f32[1,128], index: 4, kind: input, shape index: {}]   ;;  %s920_s5 = inlined_call_operand.hbm [shape: bf16[128,128], index: 5, kind: input, shape index: {}]   ;;  %s921_s6 = inlined_call_operand.vmem [shape: f32[1,128], index: 6, kind: input, shape index: {}]   ;;  %s922_s7 = inlined_call_operand.hbm [shape: f32[16,128], index: 7, kind: output, shape index: {}]  }
   0x1   :  { %13 = vsyncpa [#allocation6], 0 }
   0x2   :  { %14 = vsyncpa [#allocation9], 0 }
   0x3   :  { %15 = vsyncpa [#allocation4], 0  ;;  %s743_s24 = smov [#allocation5]   ;;  %s625_s28 = scalar_lea.hbm %s916_s1, 1024 }
   0x4   :  { %s33_s25 = sshll.u32 %s743_s24, 4  ;;  %p626_p0 = scmp.ne.s32.totalorder %s916_s1, %s625_s28  ;;  %s34_s25 = int_to_ptr.vmem [resolvable:$true] %s33_s25 }
   0x5   :  { %p629_p1 = scmp.lt.u32.totalorder %s625_s28, %s916_s1 }
   0x7   :  { %p631_p2 = pnand %p629_p1, %p626_p0 }
   0x9   :  { %634 = shalt.err (!%p631_p2)
}
   0xa   :  { %s635_s10 = scalar_lea.vmem %s34_s25, 1024  ;;  %p640_p4 = scmp.lt.s32.totalorder %s34_s25, %s34_s25 }
   0xb   :  { %p636_p3 = scmp.ne.s32.totalorder %s34_s25, %s635_s10  ;;  %p641_p5 = scmp.lt.s32.totalorder %s635_s10, %s635_s10 }
   0xd   :  { %p642_p6 = por %p641_p5, %p640_p4 }
   0xf   :  { %p643_p7 = pnand %p642_p6, %p636_p3 }
  0x11   :  { %646 = shalt.err (!%p643_p7)
}
  0x12   :  { %s744_s11 = smov 64   ;;  %s745_s12 = smov 4  }
  0x13   :  { %39 = dma.hbm_to_vmem [thread:$0]  %s916_s1, 1024, %s34_s25, [#allocation6], %s744_s11, %s744_s11, %s745_s12  }
  0x14   :  { %s746_s15 = smov [#allocation2]   ;;  %s647_s19 = scalar_lea.hbm %s915_s0, 256 }
  0x15   :  { %s21_s16 = sshll.u32 %s746_s15, 4  ;;  %p648_p8 = scmp.ne.s32.totalorder %s915_s0, %s647_s19  ;;  %s22_s16 = int_to_ptr.vmem [resolvable:$true] %s21_s16 }
  0x16   :  { %p651_p9 = scmp.lt.u32.totalorder %s647_s19, %s915_s0 }
  0x18   :  { %p653_p10 = pnand %p651_p9, %p648_p8 }
  0x1a   :  { %656 = shalt.err (!%p653_p10)
}
  0x1b   :  { %s657_s24 = scalar_lea.vmem %s22_s16, 256  ;;  %p662_p12 = scmp.lt.s32.totalorder %s22_s16, %s22_s16 }
  0x1c   :  { %p658_p11 = scmp.ne.s32.totalorder %s22_s16, %s657_s24  ;;  %p663_p13 = scmp.lt.s32.totalorder %s657_s24, %s657_s24 }
  0x1e   :  { %p664_p0 = por %p663_p13, %p662_p12 }
  0x20   :  { %p665_p1 = pnand %p664_p0, %p658_p11 }
  0x22   :  { %668 = shalt.err (!%p665_p1)
}
  0x23   :  { %s747_s1 = smov 128   ;;  %s748_s25 = smov 8  }
  0x24   :  { %27 = dma.hbm_to_vmem [thread:$0]  %s915_s0, 256, %s22_s16, [#allocation3], %s747_s1, %s747_s1, %s748_s25  }
  0x25   :  { %s749_s28 = smov [#allocation7]   ;;  %s750_s30 = smov [#allocation8]  }
  0x26   :  { %s47_s29 = sshll.u32 %s749_s28, 4  ;;  %s61_s8 = sshll.u32 %s750_s30, 4  ;;  %s48_s29 = int_to_ptr.vmem [resolvable:$true] %s47_s29  ;;  %s824_s8 = int_to_ptr.vmem [resolvable:$true] %s61_s8 }
  0x27   :  { %s669_s13 = scalar_lea.hbm %s918_s3, 1024 }
  0x28   :  { %p670_p2 = scmp.ne.s32.totalorder %s918_s3, %s669_s13  ;;  %p673_p3 = scmp.lt.u32.totalorder %s669_s13, %s918_s3 }
  0x2a   :  { %p675_p4 = pnand %p673_p3, %p670_p2 }
  0x2c   :  { %678 = shalt.err (!%p675_p4)
}
  0x2d   :  { %s679_s0 = scalar_lea.vmem %s48_s29, 1024  ;;  %p684_p6 = scmp.lt.s32.totalorder %s48_s29, %s48_s29 }
  0x2e   :  { %p680_p5 = scmp.ne.s32.totalorder %s48_s29, %s679_s0  ;;  %p685_p7 = scmp.lt.s32.totalorder %s679_s0, %s679_s0 }
  0x30   :  { %p686_p8 = por %p685_p7, %p684_p6 }
  0x32   :  { %p687_p9 = pnand %p686_p8, %p680_p5 }
  0x34   :  { %690 = shalt.err (!%p687_p9)
}
  0x35   :  { %53 = dma.hbm_to_vmem [thread:$0]  %s918_s3, 1024, %s48_s29, [#allocation6], %s744_s11, %s744_s11, %s745_s12  }
  0x36   :  { %s691_s22 = scalar_lea.hbm %s920_s5, 1024 }
  0x37   :  { %p692_p10 = scmp.ne.s32.totalorder %s920_s5, %s691_s22  ;;  %p695_p11 = scmp.lt.u32.totalorder %s691_s22, %s920_s5 }
  0x39   :  { %p697_p12 = pnand %p695_p11, %p692_p10 }
  0x3b   :  { %700 = shalt.err (!%p697_p12)
}
  0x3c   :  { %s701_s28 = scalar_lea.vmem %s824_s8, 1024  ;;  %p706_p0 = scmp.lt.s32.totalorder %s824_s8, %s824_s8 }
  0x3d   :  { %p702_p13 = scmp.ne.s32.totalorder %s824_s8, %s701_s28  ;;  %p707_p1 = scmp.lt.s32.totalorder %s701_s28, %s701_s28 }
  0x3f   :  { %p708_p2 = por %p707_p1, %p706_p0 }
  0x41   :  { %p709_p3 = pnand %p708_p2, %p702_p13 }
  0x43   :  { %712 = shalt.err (!%p709_p3)
}
  0x44   :  { %67 = dma.hbm_to_vmem [thread:$0]  %s920_s5, 1024, %s824_s8, [#allocation9], %s744_s11, %s744_s11, %s745_s12  }
  0x45   :  { %735 = dma.done.wait [#allocation3], 256  }
  0x46   :  { %736 = vsyncadd [#allocation3], 4294967040 }
  0x47   :  { %737 = dma.done.wait [#allocation6], 2048  }
  0x48   :  { %738 = vsyncadd [#allocation6], 4294965248 }
  0x49   :  { %739 = dma.done.wait [#allocation9], 1024  }
  0x4a   :  { %740 = vsyncadd [#allocation9], 4294966272  ;;  %v751_v0 = vmov 0.0   ;;  %vm752_vm0 = vmmov 0   ;;  %v589_v1 = vld [vmem:[#allocation5] sm:$0xff]   ;;  %v590_v2 = vld [vmem:[#allocation5 + $0x8] sm:$0xff]   ;;  %v438_v57 = vlaneseq }
  0x4b   :  { %518 = vmatprep.subr.bf16.mxu0 %v751_v0  ;;  %534 = vmatprep.mubr.msk.bf16.mxu0 %vm752_vm0, %v751_v0  ;;  %v591_v3 = vld [vmem:[#allocation5 + $0x10] sm:$0xff]   ;;  %v597_v4 = vld [vmem:[#allocation7] sm:$0xff]   ;;  %v592_v5 = vld [vmem:[#allocation5 + $0x18] sm:$0xff]  }
  0x4c   :  { %538 = vmatprep.subr.bf16.mxu1 %v751_v0  ;;  %554 = vmatprep.mubr.msk.bf16.mxu1 %vm752_vm0, %v751_v0  ;;  %v598_v6 = vld [vmem:[#allocation7 + $0x8] sm:$0xff]   ;;  %v593_v7 = vld [vmem:[#allocation5 + $0x20] sm:$0xff]   ;;  %v599_v8 = vld [vmem:[#allocation7 + $0x10] sm:$0xff]   ;;  %v439_v58 = vand.u32 127, %v438_v57 }
  0x4d   :  { %519 = vmatpush3.bf16.msra.mxu0 %v589_v1  ;;  %539 = vmatpush3.bf16.msra.mxu1 %v597_v4  ;;  %v594_v9 = vld [vmem:[#allocation5 + $0x28] sm:$0xff]   ;;  %v600_v10 = vld [vmem:[#allocation7 + $0x18] sm:$0xff]   ;;  %v595_v11 = vld [vmem:[#allocation5 + $0x30] sm:$0xff]  }
  0x4e   :  { %520 = vmatprep.subr.bf16.mxu0 %v751_v0  ;;  %540 = vmatprep.subr.bf16.mxu1 %v751_v0  ;;  %v596_v12 = vld [vmem:[#allocation5 + $0x38] sm:$0xff]   ;;  %v83_v13 = vld [vmem:[#allocation2] sm:$0xff]  ;;  %v601_v16 = vld [vmem:[#allocation7 + $0x20] sm:$0xff]   ;;  %vm440_vm1 = vcmp.eq.s32.totalorder %v439_v58, 0 }
  0x4f   :  { %v84_v14 = vld [vmem:[#allocation2 + $0x8] sm:$0xff]  ;;  %v602_v17 = vld [vmem:[#allocation7 + $0x28] sm:$0xff]   ;;  %v603_v18 = vld [vmem:[#allocation7 + $0x30] sm:$0xff]  }
  0x50   :  { %v102_v15 = vpack.c.bf16 %v84_v14, %v83_v13  ;;  %v604_v19 = vld [vmem:[#allocation7 + $0x38] sm:$0xff]   ;;  %v605_v20 = vld [vmem:[#allocation8] sm:$0xff]   ;;  %v606_v21 = vld [vmem:[#allocation8 + $0x8] sm:$0xff]  }
  0x51   :  { %521 = vmatpush3.bf16.msra.mxu0 %v590_v2  ;;  %541 = vmatpush3.bf16.msra.mxu1 %v598_v6  ;;  %v607_v22 = vld [vmem:[#allocation8 + $0x10] sm:$0xff]   ;;  %v608_v23 = vld [vmem:[#allocation8 + $0x18] sm:$0xff]   ;;  %v609_v34 = vld [vmem:[#allocation8 + $0x20] sm:$0xff]  }
  0x52   :  { %522 = vmatprep.subr.bf16.mxu0 %v751_v0  ;;  %542 = vmatprep.subr.bf16.mxu1 %v751_v0  ;;  %v464_v24 = vld [vmem:[%s917_s2] ss:$0 sm:$0xff]  ;;  %v610_v35 = vld [vmem:[#allocation8 + $0x28] sm:$0xff]   ;;  %v612_v37 = vld [vmem:[#allocation8 + $0x38] sm:$0xff]  }
  0x53   :  { %v611_v36 = vld [vmem:[#allocation8 + $0x30] sm:$0xff]  }
  0x54   :  { %v473_v38 = vld [vmem:[%s919_s4] ss:$0 sm:$0xff]  ;;  %s753_s4 = smov [#allocation10]  }
  0x55   :  { %523 = vmatpush3.bf16.msra.mxu0 %v591_v3  ;;  %543 = vmatpush3.bf16.msra.mxu1 %v599_v8  ;;  %v482_v48 = vld [vmem:[%s921_s6] ss:$0 sm:$0xff]  ;;  %s450_s9 = sshll.u32 %s753_s4, 4  ;;  %s451_s9 = int_to_ptr.vmem [resolvable:$true] %s450_s9 }
  0x56   :  { %524 = vmatprep.subr.bf16.mxu0 %v751_v0  ;;  %544 = vmatprep.subr.bf16.mxu1 %v751_v0  ;;  %s713_s6 = scalar_lea.vmem %s451_s9, 256  ;;  %p718_p5 = scmp.lt.s32.totalorder %s451_s9, %s451_s9 }
  0x57   :  { %p714_p4 = scmp.ne.s32.totalorder %s451_s9, %s713_s6  ;;  %p719_p6 = scmp.lt.s32.totalorder %s713_s6, %s713_s6 }
  0x59   :  { %525 = vmatpush3.bf16.msra.mxu0 %v592_v5  ;;  %545 = vmatpush3.bf16.msra.mxu1 %v600_v10  ;;  %p720_p7 = por %p719_p6, %p718_p5 }
  0x5a   :  { %526 = vmatprep.subr.bf16.mxu0 %v751_v0  ;;  %546 = vmatprep.subr.bf16.mxu1 %v751_v0 }
  0x5b   :  { %p721_p8 = pnand %p720_p7, %p714_p4 }
  0x5d   :  { %527 = vmatpush3.bf16.msra.mxu0 %v593_v7  ;;  %547 = vmatpush3.bf16.msra.mxu1 %v601_v16 }
  0x5e   :  { %528 = vmatprep.subr.bf16.mxu0 %v751_v0  ;;  %548 = vmatprep.subr.bf16.mxu1 %v751_v0 }
  0x61   :  { %529 = vmatpush3.bf16.msra.mxu0 %v594_v9  ;;  %549 = vmatpush3.bf16.msra.mxu1 %v602_v17 }
  0x62   :  { %530 = vmatprep.subr.bf16.mxu0 %v751_v0  ;;  %550 = vmatprep.subr.bf16.mxu1 %v751_v0 }
  0x65   :  { %531 = vmatpush3.bf16.msra.mxu0 %v595_v11  ;;  %551 = vmatpush3.bf16.msra.mxu1 %v603_v18 }
  0x66   :  { %532 = vmatprep.subr.bf16.mxu0 %v751_v0  ;;  %552 = vmatprep.subr.bf16.mxu1 %v751_v0 }
  0x69   :  { %533 = vmatpush3.bf16.msra.mxu0 %v596_v12  ;;  %553 = vmatpush3.bf16.msra.mxu1 %v604_v19 }
  0x6a   :  { %558 = vmatprep.subr.bf16.mxu0 %v751_v0 }
  0x6c   :  { %535 = vmatmul.mubr.bf16.vlgmr.msra.gmra.mrb[0].mxu0 %v102_v15 }
  0x6d   :  { %574 = vmatprep.mubr.msk.bf16.mxu0 %vm752_vm0, %v751_v0  ;;  %559 = vmatpush3.bf16.msra.mxu0 %v605_v20 }
  0x6e   :  { %560 = vmatprep.subr.bf16.mxu0 %v751_v0 }
  0x71   :  { %561 = vmatpush3.bf16.msra.mxu0 %v606_v21 }
  0x72   :  { %562 = vmatprep.subr.bf16.mxu0 %v751_v0 }
  0x75   :  { %563 = vmatpush3.bf16.msra.mxu0 %v607_v22 }
  0x76   :  { %564 = vmatprep.subr.bf16.mxu0 %v751_v0 }
  0x79   :  { %565 = vmatpush3.bf16.msra.mxu0 %v608_v23 }
  0x7a   :  { %566 = vmatprep.subr.bf16.mxu0 %v751_v0 }
  0x7d   :  { %567 = vmatpush3.bf16.msra.mxu0 %v609_v34 }
  0x7e   :  { %568 = vmatprep.subr.bf16.mxu0 %v751_v0 }
  0x81   :  { %569 = vmatpush3.bf16.msra.mxu0 %v610_v35 }
  0x82   :  { %570 = vmatprep.subr.bf16.mxu0 %v751_v0 }
  0x85   :  { %571 = vmatpush3.bf16.msra.mxu0 %v611_v36 }
  0x86   :  { %572 = vmatprep.subr.bf16.mxu0 %v751_v0 }
  0x89   :  { %573 = vmatpush3.bf16.msra.mxu0 %v612_v37 }
 0x13f   :  { %v191_v25 = vpop.f32.mrb[0].mxu0 }
 0x140   :  { %v192_v26 = vadd.f32 %v464_v24, %v191_v25  ;;  %v536_v27 = vpop.f32.mrb[1].mxu0 }
 0x141   :  { %v194_v28 = vpop.f32.mrb[2].mxu0 }
 0x142   :  { %v195_v29 = vadd.f32 %v464_v24, %v194_v28  ;;  %v537_v30 = vpop.f32.mrb[3].mxu0  ;;  %613 = vtanh.f32 %v192_v26 }
 0x144   :  { %615 = vtanh.f32 %v195_v29 }
 0x14c   :  { %v614_v31 = vpop.eup %613 }
 0x14e   :  { %v616_v32 = vpop.eup %615 }
 0x14f   :  { %v217_v33 = vpack.c.bf16 %v616_v32, %v614_v31 }
 0x151   :  { %555 = vmatmul.mubr.bf16.vlgmr.msra.gmra.mrb[0].mxu1 %v217_v33 }
 0x224   :  { %v306_v39 = vpop.f32.mrb[0].mxu1 }
 0x225   :  { %v307_v40 = vadd.f32 %v473_v38, %v306_v39  ;;  %v556_v41 = vpop.f32.mrb[1].mxu1 }
 0x226   :  { %v309_v42 = vpop.f32.mrb[2].mxu1 }
 0x227   :  { %v310_v43 = vadd.f32 %v473_v38, %v309_v42  ;;  %v557_v44 = vpop.f32.mrb[3].mxu1  ;;  %617 = vtanh.f32 %v307_v40 }
 0x229   :  { %619 = vtanh.f32 %v310_v43 }
 0x231   :  { %v618_v45 = vpop.eup %617 }
 0x233   :  { %v620_v46 = vpop.eup %619 }
 0x234   :  { %v332_v47 = vpack.c.bf16 %v620_v46, %v618_v45 }
 0x236   :  { %575 = vmatmul.mubr.bf16.vlgmr.msra.gmra.mrb[4].mxu0 %v332_v47 }
 0x309   :  { %v421_v49 = vpop.f32.mrb[4].mxu0 }
 0x30a   :  { %v422_v50 = vadd.f32 %v482_v48, %v421_v49  ;;  %v576_v51 = vpop.f32.mrb[5].mxu0 }
 0x30b   :  { %v424_v52 = vpop.f32.mrb[6].mxu0 }
 0x30c   :  { %v432_v53 = vmul.f32 1.442695, %v422_v50  ;;  %v425_v54 = vadd.f32 %v482_v48, %v424_v52  ;;  %v577_v55 = vpop.f32.mrb[7].mxu0  ;;  %v430_v59 = vadd.f32 1.0, %v422_v50  ;;  %vm428_vm2 = vcmp.gt.f32.partialorder %v422_v50, 0.0 }
 0x30e   :  { %621 = vpow2.f32 %v432_v53  ;;  %v434_v56 = vmul.f32 1.442695, %v425_v54  ;;  %v431_v61 = vadd.f32 1.0, %v425_v54  ;;  %vm429_vm3 = vcmp.gt.f32.partialorder %v425_v54, 0.0 }
 0x310   :  { %623 = vpow2.f32 %v434_v56 }
 0x318   :  { %v622_v60 = vpop.eup %621 }
 0x319   :  { %v436_v62 = vsel %vm428_vm2, %v430_v59, %v622_v60 }
 0x31a   :  { %v624_v63 = vpop.eup %623  ;;  %v441_v0 = vsel %vm440_vm1, %v436_v62, %v422_v50 }
 0x31b   :  { %v437_v1 = vsel %vm429_vm3, %v431_v61, %v624_v63  ;;  %443 = vst [vmem:[#allocation10] sm:$0xff] %v441_v0 }
 0x31c   :  { %v442_v2 = vsel %vm440_vm1, %v437_v1, %v425_v54 }
 0x31d   :  { %444 = vst [vmem:[#allocation10 + $0x8] sm:$0xff] %v442_v2 }
 0x31e   :  { %724 = shalt.err (!%p721_p8)
}
 0x31f   :  { %s725_s14 = scalar_lea.hbm %s922_s7, 256 }
 0x320   :  { %p726_p9 = scmp.ne.s32.totalorder %s922_s7, %s725_s14  ;;  %p729_p10 = scmp.lt.u32.totalorder %s725_s14, %s922_s7 }
 0x322   :  { %p731_p11 = pnand %p729_p10, %p726_p9 }
 0x324   :  { %734 = shalt.err (!%p731_p11)
}
 0x325   :  { %456 = dma.vmem_to_hbm [thread:$0]  %s451_s9, 256, %s922_s7, [#allocation4], %s747_s1, %s747_s1, %s748_s25  }
 0x326   :  { %741 = dma.done.wait [#allocation4], 256  }
 0x327   :  { %742 = vsyncadd [#allocation4], 4294967040 }
 0x328   :  { %460 = vsyncpa [#allocation3], 1 }
 0x329   :  { %461 = vsyncpa [#allocation6], 1 }
 0x32a   :  { %462 = vsyncpa [#allocation9], 1 }
 0x32b   :  { %463 = vsyncpa [#allocation4], 1 }

</bundles_post_ra>
